<compile_context>
chip_gen: v7x
topology: tpu7x:2x2x1
jax: 0.10.0
libtpu: 0.0.40
codegen_flags: <defaults>
</compile_context>

<pallas_src>
import jax
import jax.numpy as jnp
from jax.experimental import pallas as pl
from jax.experimental.pallas import tpu as pltpu


def _timestep_block_kernel(x_ref, scale_ref, shift_ref, o_ref):
    # Purely element-wise, memory-bound modulation: out = x * scale + shift.
    # scale/shift are (Bblk, C, 1) f32 columns -> broadcast for free over the
    # lane (spatial) axis.
    x = x_ref[...].astype(jnp.float32)
    o_ref[...] = (x * scale_ref[...] + shift_ref[...]).astype(o_ref.dtype)


def _choose_tiles(B, C, L, dtype_bytes, tile_budget_bytes):
    """Pick (Bblk, tL, n_l). One tile is (Bblk, C, tL); Pallas double-buffers
    in + out, so live VMEM is ~4x one tile -> keep a tile ~2 MiB."""
    row_bytes = C * dtype_bytes
    if row_bytes * L <= tile_budget_bytes:
        tL = L                                       # whole spatial extent (always legal)
    else:
        tL = max(128, (tile_budget_bytes // row_bytes) // 128 * 128)
        tL = min(tL, L)                              # tiny-L / huge-C corner
    n_l = pl.cdiv(L, tL)                             # ragged last tile is masked

    # Grow along batch while one tile stays inside the budget (small images
    # would otherwise be per-step-overhead bound).
    tile_bytes = row_bytes * tL
    Bblk = int(max(1, min(B, tile_budget_bytes // max(1, tile_bytes))))

    # v7x megacore: keep at least 2 parallel grid steps when there is work.
    if pl.cdiv(B, Bblk) * n_l < 2 and B > 1:
        Bblk = pl.cdiv(B, 2)
    return Bblk, tL, n_l


def timestep_block(x, t, params, *, tile_budget_bytes=2 << 20):
    """x: (B, C, H, W); t: (B, c_timestep). Matches PyTorch TimestepBlock.forward."""
    B, C, H, W = x.shape
    L = H * W

    # --- mapper (tiny Linear) hoisted out of the kernel ----------------------
    w = params['mapper_w'].astype(jnp.float32)       # (2C, c_timestep), nn.Linear layout
    bias = params['mapper_b'].astype(jnp.float32)    # (2C,)
    ab = t.astype(jnp.float32) @ w.T + bias          # (B, 2C)
    scale = (1.0 + ab[:, :C]).reshape(B, C, 1)       # (B, C, 1) f32, folds "1 + a"
    shift = ab[:, C:].reshape(B, C, 1)               # (B, C, 1) f32

    # --- lane-dense view of x: NCHW -> (B, C, L), spatial on lanes -----------
    x_flat = x.reshape(B, C, L)                      # free view, no transpose

    dtype_bytes = jnp.dtype(x.dtype).itemsize
    Bblk, tL, n_l = _choose_tiles(B, C, L, dtype_bytes, tile_budget_bytes)
    grid = (pl.cdiv(B, Bblk), n_l)

    # Explicit VMEM plan: 2x(in tile) + 2x(out tile) + residents + slack.
    x_tile_bytes = Bblk * C * tL * dtype_bytes
    ab_tile_bytes = Bblk * C * 4
    vmem_limit = max(16 << 20, 4 * x_tile_bytes + 8 * ab_tile_bytes + (2 << 20))

    grid_spec = pltpu.PrefetchScalarGridSpec(
        num_scalar_prefetch=0,
        grid=grid,
        in_specs=[
            pl.BlockSpec((Bblk, C, tL), lambda bi, li: (bi, 0, li)),
            pl.BlockSpec((Bblk, C, 1), lambda bi, li: (bi, 0, 0)),
            pl.BlockSpec((Bblk, C, 1), lambda bi, li: (bi, 0, 0)),
        ],
        out_specs=pl.BlockSpec((Bblk, C, tL), lambda bi, li: (bi, 0, li)),
    )

    # TODO(synk): if profiling still shows exposed DMA on many small grid
    # steps, add pipeline_mode=pl.Buffered(3) on the x/out specs (VMEM allowing).
    out_flat = pl.pallas_call(
        _timestep_block_kernel,
        out_shape=jax.ShapeDtypeStruct((B, C, L), x.dtype),
        grid_spec=grid_spec,
        compiler_params=pltpu.CompilerParams(
            dimension_semantics=("parallel", "parallel"),
            vmem_limit_bytes=int(vmem_limit)),
    )(x_flat, scale, shift)

    return out_flat.reshape(B, C, H, W)


def timestep_block_reference(x, t, params):
    """Pure-JAX reference mirroring the PyTorch module semantics."""
    C = x.shape[1]
    ab = (t.astype(jnp.float32) @ params['mapper_w'].astype(jnp.float32).T
          + params['mapper_b'].astype(jnp.float32))
    a = ab[:, :C][:, :, None, None]
    b = ab[:, C:][:, :, None, None]
    return (x.astype(jnp.float32) * (1.0 + a) + b).astype(x.dtype)


if __name__ == "__main__":
    B, C, c_timestep = 2, 64, 32

    key = jax.random.PRNGKey(0)
    k0, k1, k2, k3 = jax.random.split(key, 4)
    params = {
        'mapper_w': jax.random.normal(k0, (2 * C, c_timestep), jnp.float32) * 0.05,
        'mapper_b': jax.random.normal(k1, (2 * C,), jnp.float32) * 0.05,
    }
    t = jax.random.normal(k3, (B, c_timestep), jnp.float32)

    # 1) f32, 128-multiple spatial extent
    x = jax.random.normal(k2, (B, C, 16, 16), jnp.float32)
    out = jax.block_until_ready(timestep_block(x, t, params))
    ref = timestep_block_reference(x, t, params)
    assert out.shape == x.shape
    assert jnp.allclose(out, ref, atol=1e-5, rtol=1e-5), "f32 mismatch vs reference"

    # 2) f32, spatial extent NOT a multiple of 128 (no divisibility requirement)
    x2 = jax.random.normal(k2, (B, C, 12, 12), jnp.float32)
    out2 = jax.block_until_ready(timestep_block(x2, t, params))
    ref2 = timestep_block_reference(x2, t, params)
    assert jnp.allclose(out2, ref2, atol=1e-5, rtol=1e-5), "ragged-L mismatch vs reference"

    # 3) bf16 activations (dtype-robust store path)
    x3 = jax.random.normal(k2, (B, C, 16, 16), jnp.float32).astype(jnp.bfloat16)
    out3 = jax.block_until_ready(timestep_block(x3, t, params))
    ref3 = timestep_block_reference(x3, t, params)
    assert jnp.allclose(out3.astype(jnp.float32), ref3.astype(jnp.float32),
                        atol=5e-2, rtol=5e-2), "bf16 mismatch vs reference"

    print("KERNEL_OK")
</pallas_src>

<mosaic_0001>
module attributes {stable_mosaic.version = 11 : i64} {
  func.func @_timestep_block_kernel(%arg0: i32, %arg1: i32, %arg2: memref<1x64x256xf32, #tpu.memory_space<vmem>>, %arg3: memref<1x64x1xf32, #tpu.memory_space<vmem>>, %arg4: memref<1x64x1xf32, #tpu.memory_space<vmem>>, %arg5: memref<1x64x256xf32, #tpu.memory_space<vmem>>) attributes {dimension_semantics = [#tpu.dimension_semantics<parallel>, #tpu.dimension_semantics<parallel>], iteration_bounds = array<i64: 2, 1>, scalar_prefetch = 0 : i64, scratch_operands = 0 : i64, tpu.core_type = #tpu.core_type<tc>, window_params = [{transform_indices = @transform_0, window_bounds = array<i64: 1, 64, 256>}, {transform_indices = @transform_1, window_bounds = array<i64: 1, 64, 1>}, {transform_indices = @transform_2, window_bounds = array<i64: 1, 64, 1>}, {transform_indices = @transform_3, window_bounds = array<i64: 1, 64, 256>}]} {
    %c0 = arith.constant 0 : index
    %c0_0 = arith.constant 0 : index
    %c0_1 = arith.constant 0 : index
    %0 = vector.load %arg2[%c0, %c0_0, %c0_1] : memref<1x64x256xf32, #tpu.memory_space<vmem>>, vector<1x64x256xf32>
    %c0_2 = arith.constant 0 : index
    %c0_3 = arith.constant 0 : index
    %c0_4 = arith.constant 0 : index
    %1 = vector.load %arg3[%c0_2, %c0_3, %c0_4] : memref<1x64x1xf32, #tpu.memory_space<vmem>>, vector<1x64x1xf32>
    %2 = vector.broadcast %1 : vector<1x64x1xf32> to vector<1x64x256xf32>
    %3 = arith.mulf %0, %2 : vector<1x64x256xf32>
    %c0_5 = arith.constant 0 : index
    %c0_6 = arith.constant 0 : index
    %c0_7 = arith.constant 0 : index
    %4 = vector.load %arg4[%c0_5, %c0_6, %c0_7] : memref<1x64x1xf32, #tpu.memory_space<vmem>>, vector<1x64x1xf32>
    %5 = vector.broadcast %4 : vector<1x64x1xf32> to vector<1x64x256xf32>
    %6 = arith.addf %3, %5 : vector<1x64x256xf32>
    %c0_8 = arith.constant 0 : index
    %c0_9 = arith.constant 0 : index
    %c0_10 = arith.constant 0 : index
    %7 = vector.load %arg5[%c0_8, %c0_9, %c0_10] : memref<1x64x256xf32, #tpu.memory_space<vmem>>, vector<1x64x256xf32>
    tpu.vector_store %arg5[%c0_8, %c0_9, %c0_10], %6 {strides = array<i32>} : memref<1x64x256xf32, #tpu.memory_space<vmem>>, vector<1x64x256xf32>,
    return
  }
  func.func @transform_0(%arg0: i32, %arg1: i32) -> (i32, i32, i32) {
    %c0_i32 = arith.constant 0 : i32
    %c0_i32_0 = arith.constant 0 : i32
    return %arg0, %c0_i32, %arg1 : i32, i32, i32
  }
  func.func @transform_1(%arg0: i32, %arg1: i32) -> (i32, i32, i32) {
    %c0_i32 = arith.constant 0 : i32
    %c0_i32_0 = arith.constant 0 : i32
    %c0_i32_1 = arith.constant 0 : i32
    return %arg0, %c0_i32, %c0_i32_0 : i32, i32, i32
  }
  func.func @transform_2(%arg0: i32, %arg1: i32) -> (i32, i32, i32) {
    %c0_i32 = arith.constant 0 : i32
    %c0_i32_0 = arith.constant 0 : i32
    %c0_i32_1 = arith.constant 0 : i32
    return %arg0, %c0_i32, %c0_i32_0 : i32, i32, i32
  }
  func.func @transform_3(%arg0: i32, %arg1: i32) -> (i32, i32, i32) {
    %c0_i32 = arith.constant 0 : i32
    %c0_i32_0 = arith.constant 0 : i32
    return %arg0, %c0_i32, %arg1 : i32, i32, i32
  }
}

</mosaic_0001>

<bundles_post_ra>
// kernel: tpu_custom_call.1
= control target key start
LH: loop header
LB: loop body
LE: loop exit
PB: predicated region body
PF: predicated region fallthrough
CT: control target
= control target key end

     0   :  { %8 = vsyncpa [#allocation3], 0  ;;  %s870_s0 = inlined_call_operand.vmem [shape: f32[2,64,256], index: 0, kind: input, shape index: {}]   ;;  %s871_s1 = inlined_call_operand.vmem [shape: f32[2,64,1], index: 1, kind: input, shape index: {}]   ;;  %s872_s2 = inlined_call_operand.vmem [shape: f32[2,64,1], index: 2, kind: input, shape index: {}]   ;;  %s873_s3 = inlined_call_operand.hbm [shape: f32[2,64,256], index: 3, kind: output, shape index: {}]  }
   0x1   :  { %10 = vsyncpa [#allocation3 + $0x1], 0  ;;  %s704_s12 = smov 0   ;;  %s706_s13 = smov 0  }
   0x2   :  { %s708_s14 = smov 0   ;;  %s710_s15 = smov 0  }
   0x3   :  { %s712_s16 = smov 0   ;;  %s714_s17 = smov 0  }
   0x4 LB: > { %s519_s18 = sadd.s32 4294967295, %s678_s17   ;;  %s520_s19 = sadd.s32 4294967294, %s678_s17   ;;  %s678_s17 = sphi %s714_s17, %s16_s17   ;;  %s674_s16 = sphi %s712_s16, %s880_s16   ;;  %s670_s15 = sphi %s710_s15, %s879_s15   ;;  %s666_s14 = sphi %s708_s14, %s878_s14   ;;  %s662_s13 = sphi %s706_s13, %s877_s13   ;;  %s658_s12 = sphi %s704_s12, %s876_s12  }
   0x5   : > { %s28_s20 = sadd.s32 1, %s674_s16  ;;  %s117_s21 = sadd.s32 1, %s666_s14 }
   0x6   : > { %p30_p0 = scmp.ge.s32.totalorder %s28_s20, 2  ;;  %p127_p1 = scmp.ne.s32.totalorder %s666_s14, %s662_s13 }
   0x7   : > { %p128_p2 = scmp.eq.s32.totalorder %s519_s18, 1  ;;  %p133_p3 = scmp.ne.s32.totalorder %s662_s13, %s658_s12 }
   0x8   : > { %s882_s20 = smov (%p30_p0, %s28_s20), 0  ;;  %p134_p5 = scmp.eq.s32.totalorder %s520_s19, 1 }
   0x9   : > { %p744_p4 = por %p128_p2, %p127_p1  ;;  %s112_s23 = ssub.s32 %s674_s16, %s882_s20 }
   0xa   : > { %p523_p6 = scmp.ge.s32.totalorder %s678_s17, 1  ;;  %p115_p7 = scmp.eq.s32.totalorder %s112_s23, 0 }
   0xb   : > { %p751_p8 = por %p134_p5, %p133_p3  ;;  %p181_p9 = scmp.lt.s32.totalorder %s678_s17, 3 }
   0xc   : > { %s757_s25 = scalar_select %p115_p7, %s666_s14, %s117_s21  }
   0xd   : > { %p182_p10 = pnand %p523_p6, %p181_p9 }
   0xe   : > { %p220_p11 = scmp.lt.s32.totalorder (!%p182_p10), %s670_s15, 1  ;;  %v680_v0 = vmov (!%p182_p10), 0   ;;  %s216_s11 = sand.u32 (!%p182_p10), 1, %s662_s13  }
   0xf   : > { %185 = sbr.rel (%p182_p10) target bundleno = 201 (0xc9), region = 32  ;;  %599 = vset.pattern.permute.xlu1 (!%p182_p10), %v680_v0  ;;  %598 = vset.pattern.permute.xlu0 (!%p182_p10), %v680_v0  ;;  %s524_s18 = sshll.u32 (!%p182_p10), %s216_s11, 7 }
  0x10   : > { %s788_s19 = scalar_lea.vmem (!%p182_p10), [#allocation2], %s524_s18  ;;  %s539_s21 = sshll.u32 (!%p182_p10), %s670_s15, 11 }
  0x11   : > { %s416_s23 = sshll.u32 (!%p182_p10), %s788_s19, 4  ;;  %s824_s28 = scalar_lea.sflag (!%p182_p10), [#allocation3], %s216_s11  ;;  %s816_s23 = int_to_ptr.vmem [resolvable:$true] %s416_s23 }
  0x12   : > { %s600_s29 = scalar_lea.vmem (!%p182_p10), %s816_s23, 2048 }
  0x13   : > { %p601_p12 = scmp.ne.s32.totalorder (!%p182_p10), %s816_s23, %s600_s29 }
  0x15   : > { %p602_p13 = pnand (!%p182_p10), %p601_p12, %p744_p4 }
  0x16   : > { %s761_s26 = scalar_select %p220_p11, %s670_s15, 1 }
  0x17   : > { %s814_s15 = scalar_lea.hbm %s873_s3, %s539_s21  ;;  %p603_p0 = pneg %p602_p13 }
  0x18   : > { %s537_s27 = sshll.u32 %s761_s26, 6  ;;  %s536_s7 = sshll.u32 %s761_s26, 7 }
  0x19   : > { %s233_s30 = scalar_lea.vmem %s871_s1, %s537_s27  ;;  %s238_s6 = scalar_lea.vmem %s872_s2, %s537_s27 }
  0x1a   : > { %v258_v1 = vld [vmem:[%s233_s30 + $0x10] sm:$0xff]  ;;  %v256_v2 = vld [vmem:[%s233_s30] sm:$0xff]  ;;  %v259_v3 = vld [vmem:[%s233_s30 + $0x18] sm:$0xff]  ;;  %s774_s10 = scalar_lea.vmem %s870_s0, %s536_s7 }
  0x1b   : > { %276 = vperm.xlu1 %599, %v258_v1   ;;  %266 = vperm.xlu0 %598, %v256_v2   ;;  %v257_v4 = vld [vmem:[%s233_s30 + $0x8] sm:$0xff]  ;;  %v260_v6 = vld [vmem:[%s233_s30 + $0x20] sm:$0xff]  ;;  %v263_v7 = vld [vmem:[%s233_s30 + $0x38] sm:$0xff] }
  0x1c   : > { %v261_v5 = vld [vmem:[%s233_s30 + $0x28] sm:$0xff]  ;;  %v262_v8 = vld [vmem:[%s233_s30 + $0x30] sm:$0xff]  ;;  %v320_v10 = vld [vmem:[%s238_s6] sm:$0xff]  ;;  %s681_s30 = smov [#allocation2]  }
  0x1d   : > { %v321_v9 = vld [vmem:[%s238_s6 + $0x8] sm:$0xff]  ;;  %v323_v11 = vld [vmem:[%s238_s6 + $0x18] sm:$0xff]  ;;  %v322_v12 = vld [vmem:[%s238_s6 + $0x10] sm:$0xff]  ;;  %s604_s4 = sshll.u32 %s681_s30, 4  ;;  %s605_s4 = int_to_ptr.vmem [resolvable:$false] %s604_s4 }
  0x1e   : > { %v325_v13 = vld [vmem:[%s238_s6 + $0x28] sm:$0xff]  ;;  %v324_v14 = vld [vmem:[%s238_s6 + $0x20] sm:$0xff]  ;;  %v327_v15 = vld [vmem:[%s238_s6 + $0x38] sm:$0xff]  ;;  %s606_s5 = scalar_lea.vmem %s605_s4, 4096  ;;  %p607_p1 = scmp.lt.s32.totalorder %s816_s23, %s605_s4 }
  0x1f   : > { %281 = vperm.xlu1 %599, %v259_v3   ;;  %271 = vperm.xlu0 %598, %v257_v4   ;;  %v326_v16 = vld [vmem:[%s238_s6 + $0x30] sm:$0xff]  ;;  %v240_v23 = vld [vmem:[%s774_s10] sm:$0xff]  ;;  %v241_v24 = vld [vmem:[%s774_s10 + $0x8] sm:$0xff]  ;;  %p608_p2 = scmp.lt.s32.totalorder %s606_s5, %s600_s29 }
  0x20   : > { %v242_v25 = vld [vmem:[%s774_s10 + $0x10] sm:$0xff]  ;;  %v243_v26 = vld [vmem:[%s774_s10 + $0x18] sm:$0xff]  ;;  %v244_v29 = vld [vmem:[%s774_s10 + $0x20] sm:$0xff] }
  0x21   : > { %v245_v34 = vld [vmem:[%s774_s10 + $0x28] sm:$0xff]  ;;  %v246_v35 = vld [vmem:[%s774_s10 + $0x30] sm:$0xff]  ;;  %v247_v36 = vld [vmem:[%s774_s10 + $0x38] sm:$0xff]  ;;  %p609_p3 = por %p608_p2, %p607_p1 }
  0x22   : > { %v250_v47 = vld [vmem:[%s774_s10 + $0x50] sm:$0xff]  ;;  %v251_v48 = vld [vmem:[%s774_s10 + $0x58] sm:$0xff]  ;;  %v248_v49 = vld [vmem:[%s774_s10 + $0x40] sm:$0xff] }
  0x23   : > { %291 = vperm.xlu1 %599, %v261_v5   ;;  %286 = vperm.xlu0 %598, %v260_v6   ;;  %v249_v50 = vld [vmem:[%s774_s10 + $0x48] sm:$0xff]  ;;  %v254_v61 = vld [vmem:[%s774_s10 + $0x70] sm:$0xff]  ;;  %v255_v62 = vld [vmem:[%s774_s10 + $0x78] sm:$0xff]  ;;  %p610_p5 = pnand %p609_p3, %p603_p0 }
  0x24   : > { %v252_v63 = vld [vmem:[%s774_s10 + $0x60] sm:$0xff]  ;;  %v253_v0 = vld [vmem:[%s774_s10 + $0x68] sm:$0xff] }
  0x27   : > { %301 = vperm.xlu1 %599, %v263_v7   ;;  %296 = vperm.xlu0 %598, %v262_v8  }
  0x2b   : > { %335 = vperm.xlu1 %599, %v321_v9   ;;  %330 = vperm.xlu0 %598, %v320_v10  }
  0x2f   : > { %345 = vperm.xlu1 %599, %v323_v11   ;;  %340 = vperm.xlu0 %598, %v322_v12  }
  0x33   : > { %355 = vperm.xlu1 %599, %v325_v13   ;;  %350 = vperm.xlu0 %598, %v324_v14  }
  0x37   : > { %365 = vperm.xlu1 %599, %v327_v15   ;;  %360 = vperm.xlu0 %598, %v326_v16  }
  0x9a   : > { %v277_v17 = vpop.permute.xlu1 %276  ;;  %v267_v18 = vpop.permute.xlu0 %266 }
  0x9b   : > { %v304_v30 = vmul.f32 %v267_v18, %v240_v23  ;;  %v305_v31 = vmul.f32 %v267_v18, %v241_v24  ;;  %v308_v43 = vmul.f32 %v277_v17, %v244_v29  ;;  %v309_v44 = vmul.f32 %v277_v17, %v245_v34 }
  0x9e   : > { %v282_v19 = vpop.permute.xlu1 %281  ;;  %v272_v20 = vpop.permute.xlu0 %271 }
  0x9f   : > { %v306_v32 = vmul.f32 %v272_v20, %v242_v25  ;;  %v307_v33 = vmul.f32 %v272_v20, %v243_v26  ;;  %v310_v45 = vmul.f32 %v282_v19, %v246_v35  ;;  %v311_v46 = vmul.f32 %v282_v19, %v247_v36 }
  0xa2   : > { %v292_v21 = vpop.permute.xlu1 %291  ;;  %v287_v22 = vpop.permute.xlu0 %286 }
  0xa3   : > { %v314_v57 = vmul.f32 %v292_v21, %v250_v47  ;;  %v315_v58 = vmul.f32 %v292_v21, %v251_v48  ;;  %v312_v59 = vmul.f32 %v287_v22, %v248_v49  ;;  %v313_v60 = vmul.f32 %v287_v22, %v249_v50 }
  0xa6   : > { %v302_v27 = vpop.permute.xlu1 %301  ;;  %v297_v28 = vpop.permute.xlu0 %296 }
  0xa7   : > { %v318_v7 = vmul.f32 %v302_v27, %v254_v61  ;;  %v319_v8 = vmul.f32 %v302_v27, %v255_v62  ;;  %v316_v9 = vmul.f32 %v297_v28, %v252_v63  ;;  %v317_v10 = vmul.f32 %v297_v28, %v253_v0 }
  0xaa   : > { %v336_v37 = vpop.permute.xlu1 %335  ;;  %v331_v38 = vpop.permute.xlu0 %330 }
  0xab   : > { %v370_v39 = vadd.f32 %v336_v37, %v306_v32  ;;  %v371_v40 = vadd.f32 %v336_v37, %v307_v33  ;;  %v368_v41 = vadd.f32 %v331_v38, %v304_v30  ;;  %v369_v42 = vadd.f32 %v331_v38, %v305_v31 }
  0xad   : > { %386 = vst [vmem:[%s788_s19 + $0x10] sm:$0xff] %v370_v39  ;;  %387 = vst [vmem:[%s788_s19 + $0x18] sm:$0xff] %v371_v40 }
  0xae   : > { %384 = vst [vmem:[%s788_s19] sm:$0xff] %v368_v41  ;;  %385 = vst [vmem:[%s788_s19 + $0x8] sm:$0xff] %v369_v42  ;;  %v346_v51 = vpop.permute.xlu1 %345  ;;  %v341_v52 = vpop.permute.xlu0 %340 }
  0xaf   : > { %v374_v53 = vadd.f32 %v346_v51, %v310_v45  ;;  %v375_v54 = vadd.f32 %v346_v51, %v311_v46  ;;  %v372_v55 = vadd.f32 %v341_v52, %v308_v43  ;;  %v373_v56 = vadd.f32 %v341_v52, %v309_v44 }
  0xb1   : > { %390 = vst [vmem:[%s788_s19 + $0x30] sm:$0xff] %v374_v53  ;;  %391 = vst [vmem:[%s788_s19 + $0x38] sm:$0xff] %v375_v54 }
  0xb2   : > { %388 = vst [vmem:[%s788_s19 + $0x20] sm:$0xff] %v372_v55  ;;  %389 = vst [vmem:[%s788_s19 + $0x28] sm:$0xff] %v373_v56  ;;  %v356_v1 = vpop.permute.xlu1 %355  ;;  %v351_v2 = vpop.permute.xlu0 %350 }
  0xb3   : > { %v378_v3 = vadd.f32 %v356_v1, %v314_v57  ;;  %v379_v4 = vadd.f32 %v356_v1, %v315_v58  ;;  %v376_v5 = vadd.f32 %v351_v2, %v312_v59  ;;  %v377_v6 = vadd.f32 %v351_v2, %v313_v60 }
  0xb5   : > { %394 = vst [vmem:[%s788_s19 + $0x50] sm:$0xff] %v378_v3  ;;  %395 = vst [vmem:[%s788_s19 + $0x58] sm:$0xff] %v379_v4 }
  0xb6   : > { %392 = vst [vmem:[%s788_s19 + $0x40] sm:$0xff] %v376_v5  ;;  %393 = vst [vmem:[%s788_s19 + $0x48] sm:$0xff] %v377_v6  ;;  %v366_v11 = vpop.permute.xlu1 %365  ;;  %v361_v12 = vpop.permute.xlu0 %360 }
  0xb7   : > { %v382_v13 = vadd.f32 %v366_v11, %v318_v7  ;;  %v383_v14 = vadd.f32 %v366_v11, %v319_v8  ;;  %v380_v15 = vadd.f32 %v361_v12, %v316_v9  ;;  %v381_v16 = vadd.f32 %v361_v12, %v317_v10 }
  0xb9   : > { %398 = vst [vmem:[%s788_s19 + $0x70] sm:$0xff] %v382_v13  ;;  %399 = vst [vmem:[%s788_s19 + $0x78] sm:$0xff] %v383_v14 }
  0xba   : > { %396 = vst [vmem:[%s788_s19 + $0x60] sm:$0xff] %v380_v15  ;;  %397 = vst [vmem:[%s788_s19 + $0x68] sm:$0xff] %v381_v16 }
  0xbb   : > { %613 = shalt.err (!%p610_p5)
}
  0xbc   : > { %s614_s6 = scalar_lea.hbm %s814_s15, 2048  ;;  %s618_s9 = scalar_lea.hbm %s873_s3, 4096 }
  0xbd   : > { %p615_p6 = scmp.ne.s32.totalorder %s814_s15, %s614_s6  ;;  %p619_p10 = scmp.lt.u32.totalorder %s814_s15, %s873_s3 }
  0xbe   : > { %p620_p11 = scmp.lt.u32.totalorder %s618_s9, %s614_s6  ;;  %p622_p13 = scmp.lt.u32.totalorder %s614_s6, %s814_s15 }
  0xbf   : > { %p616_p7 = pnand %p615_p6, %p744_p4 }
  0xc0   : > { %p621_p12 = por %p620_p11, %p619_p10 }
  0xc1   : > { %p617_p9 = pneg %p616_p7 }
  0xc2   : > { %p623_p0 = por %p622_p13, %p621_p12 }
  0xc4   : > { %p624_p1 = pnand %p623_p0, %p617_p9 }
  0xc6   : > { %627 = shalt.err (!%p624_p1)
}
  0xc7   : > { %s682_s18 = smov 256   ;;  %s683_s19 = smov 16  }
  0xc8   : > { %540 = dma.vmem_to_hbm [thread:$0]  (%p744_p4), %s816_s23, 2048, %s814_s15, %s824_s28, %s682_s18, %s682_s18, %s683_s19  }
  0xc9 PF: > { %p546_p2 = scmp.ge.s32.totalorder %s678_s17, 2  ;;  %s431_s21 = sand.u32 1, %s658_s12  }
  0xca   : > { %s432_s26 = scalar_lea.sflag [#allocation3], %s431_s21 }
  0xcb   : > { %p543_p3 = pnand %p546_p2, %p751_p8 }
  0xcd   : > { %653 = dma.done.wait (!%p543_p3), %s432_s26, 2048  }
  0xce   : > { %655 = vsyncadd (!%p543_p3), %s432_s26, 4294965248  ;;  %s16_s17 = sadd.s32 1, %s678_s17   ;;  %s876_s12 = smov %s662_s13 }
  0xcf   : > { %p13_p5 = scmp.ge.s32.totalorder %s16_s17, 4   ;;  %s877_s13 = smov %s666_s14 }
  0xd0   : > { %s878_s14 = smov %s757_s25  ;;  %s879_s15 = smov %s674_s16 }
  0xd1   : > { %s880_s16 = smov %s882_s20  ;;  %15 = sbr.rel (!%p13_p5) target bundleno = 4 (0x4), region = 73 }
  0xd8   :  { %437 = vsyncpa [#allocation3], 1 }
  0xd9   :  { %439 = vsyncpa [#allocation3 + $0x1], 1 }

</bundles_post_ra>
